<compile_context>
chip_gen: v6e
topology: v6e:2x2x1
jax: 0.10.0
libtpu: 0.0.40
codegen_flags: <defaults>
</compile_context>

<pallas_src>
import functools

import jax
import jax.numpy as jnp
from jax.experimental import pallas as pl
from jax.experimental.pallas import tpu as pltpu

SIGMA = 15.0
POINTS = 3

# Per-grid-step VMEM *data* footprint target (M + double-buffered X + out).
# Comfortable on every generation: v5e (16 MiB scoped default / 128 MiB phys),
# v6e (32 / 128 MiB), v7x (32 / 64 MiB).
_VMEM_FOOTPRINT_BUDGET = 24 * 1024 * 1024
# Raise v5e's 16 MiB scoped default; stays well below v7x's 64 MiB physical.
_VMEM_LIMIT_BYTES = 48 * 1024 * 1024


# ----------------------------- glue (plain JAX) -----------------------------

def _catmull_rom_weights(t):
    t2 = t * t
    t3 = t2 * t
    w_m1 = 0.5 * (-t3 + 2.0 * t2 - t)
    w_0 = 0.5 * (3.0 * t3 - 5.0 * t2 + 2.0)
    w_1 = 0.5 * (-3.0 * t3 + 4.0 * t2 + t)
    w_2 = 0.5 * (t3 - t2)
    return (w_m1, w_0, w_1, w_2)


def _dense_displacement(coarse, h_dim):
    """Upsample `points` coarse control displacements to one value per row."""
    pts = coarse.shape[0]
    h = jnp.arange(h_dim, dtype=jnp.float32)
    denom = float(max(h_dim - 1, 1))            # guard H == 1
    u = h * (pts - 1) / denom                   # map rows onto the coarse grid
    i0 = jnp.clip(jnp.floor(u).astype(jnp.int32), 0, pts - 2)
    t = u - i0.astype(jnp.float32)
    weights = _catmull_rom_weights(t)
    disp = jnp.zeros((h_dim,), jnp.float32)
    for k, w in zip((-1, 0, 1, 2), weights):
        idx = jnp.clip(i0 + k, 0, pts - 1)      # edge-clamped taps
        disp = disp + w * coarse[idx]
    return disp


def _build_resample_matrix(disp, h_dim):
    """(H, H) weight matrix: out_row[h] = sum_k M[h, k] * in_row[k]."""
    h = jnp.arange(h_dim, dtype=jnp.float32)
    s = h + disp                                # source row coordinate
    i0 = jnp.floor(s).astype(jnp.int32)
    t = s - i0.astype(jnp.float32)
    weights = _catmull_rom_weights(t)
    m = jnp.zeros((h_dim, h_dim), jnp.float32)
    for k, w in zip((-1, 0, 1, 2), weights):
        idx = i0 + k
        valid = ((idx >= 0) & (idx < h_dim)).astype(jnp.float32)  # cval=0 border
        onehot = jax.nn.one_hot(jnp.clip(idx, 0, h_dim - 1), h_dim,
                                dtype=jnp.float32)
        m = m + (w * valid)[:, None] * onehot
    return m


# ------------------------------ tiling policy --------------------------------

def _choose_col_tile(h, cols):
    """Pick the column tile width (multiple of 128) and padded column count.

    Per-step VMEM data footprint (M single-buffered, X/out double-buffered,
    all bf16):  h*h*2  +  2*h*tn*2  +  2*h*tn*2.
    """
    bytes_m = h * h * 2                     # bf16, 1 buffer (pl.Buffered(1))
    per_col = (2 + 2) * h * 2               # 2 input bufs + 2 output bufs, bf16
    tn_budget = max(
        128, ((_VMEM_FOOTPRINT_BUDGET - bytes_m) // per_col // 128) * 128)
    # Bigger tiles amortize the ~0.35us/step pipeline overhead; at small H the
    # kernel is overhead/DMA-bound, so go wider (measured: 512->85%, 1024->86%
    # of HBM roofline vs 29% at 128).
    tn_target = 1024 if h <= 256 else 512
    cols128 = pl.cdiv(cols, 128) * 128
    tn = min(tn_target, tn_budget, cols128)
    # v7x megacore: the "parallel" column axis only feeds both TensorCores when
    # the grid has >= 2 steps; split whenever the width allows it.
    if cols128 >= 256 and pl.cdiv(cols128, tn) < 2:
        tn = max(128, ((cols128 // 2) // 128) * 128)
    # Pad columns up to a multiple of tn so every block is full width
    # (lane-dense, unmasked stores) instead of degrading tn to 128.
    cols_pad = pl.cdiv(cols, tn) * tn
    return tn, cols_pad


# ------------------------------ Pallas kernel --------------------------------

def _deform_kernel(m_ref, x_ref, o_ref):
    # m_ref: (H, H)  bf16 resampling weights (constant index_map -> resident)
    # x_ref: (H, TN) bf16 column tile of the fused (N*C*W) axis
    # o_ref: (H, TN) bf16 output tile; f32 MXU accumulation, bf16 store
    o_ref[...] = jnp.dot(m_ref[...], x_ref[...],
                         preferred_element_type=jnp.float32).astype(o_ref.dtype)


@functools.partial(jax.jit, static_argnames=("sigma", "points"))
def elastic_deform(x, key, sigma=SIGMA, points=POINTS):
    n, c, h, w = x.shape
    out_dtype = x.dtype

    # coarse random displacement grid, shape (points,) ~ N(0, sigma)
    coarse = sigma * jax.random.normal(key, (points,), dtype=jnp.float32)
    disp = _dense_displacement(coarse, h)
    # bf16 operands: effective precision of the resampling is bf16 even though
    # the result is returned in the caller's dtype (documented; see TODO).
    m = _build_resample_matrix(disp, h).astype(jnp.bfloat16)

    # Fuse N, C, W into one lane-dense column axis: X = (H, N*C*W); the whole
    # batch becomes a single (H,H) @ (H, cols) matmul.  Under jit this
    # transpose+reshape+cast+pad fuses into one HBM pass.
    cols = n * c * w
    xt = jnp.transpose(x, (2, 0, 1, 3)).reshape(h, cols).astype(jnp.bfloat16)

    tn, cols_pad = _choose_col_tile(h, cols)
    if cols_pad != cols:
        xt = jnp.pad(xt, ((0, 0), (0, cols_pad - cols)))

    cost = pl.CostEstimate(
        flops=2 * h * h * cols_pad,
        transcendentals=0,
        bytes_accessed=h * h * 2 + 2 * h * cols_pad * 2,   # M + X + out (bf16)
    )

    out = pl.pallas_call(
        _deform_kernel,
        # Store bf16 from the kernel; the upcast to the caller dtype rides the
        # post-kernel transpose for free and halves kernel store bytes.
        out_shape=jax.ShapeDtypeStruct((h, cols_pad), jnp.bfloat16),
        grid_spec=pltpu.PrefetchScalarGridSpec(
            num_scalar_prefetch=0,
            grid=(cols_pad // tn,),                             # column tiles
            in_specs=[
                # Weights: constant index_map -> DMA'd once; single-buffered so
                # only one (H,H) copy is resident in VMEM.
                pl.BlockSpec((h, h), lambda j: (0, 0),
                             pipeline_mode=pl.Buffered(buffer_count=1)),
                pl.BlockSpec((h, tn), lambda j: (0, j)),        # input columns
            ],
            out_specs=pl.BlockSpec((h, tn), lambda j: (0, j)),  # lane-dense out
        ),
        compiler_params=pltpu.CompilerParams(
            # parallel column axis -> both TensorCores get work on v7x
            dimension_semantics=("parallel",),
            vmem_limit_bytes=_VMEM_LIMIT_BYTES,
        ),
        cost_estimate=cost,
    )(m, xt)

    out = out[:, :cols].reshape(h, n, c, w)
    return jnp.transpose(out, (1, 2, 0, 3)).astype(out_dtype)


# ---------------------------------- main --------------------------------------

if __name__ == "__main__":
    key = jax.random.PRNGKey(0)
    k_img, k_def = jax.random.split(key)

    n, c, h, w = 2, 4, 16, 16
    x = jax.random.normal(k_img, (n, c, h, w), dtype=jnp.float32)

    y = elastic_deform(x, k_def)
    jax.block_until_ready(y)

    assert y.shape == (n, c, h, w)
    assert y.dtype == x.dtype
    print("KERNEL_OK")
</pallas_src>

<mosaic_0001>
module attributes {stable_mosaic.version = 11 : i64} {
  func.func @_deform_kernel(%arg0: i32, %arg1: memref<16x16xbf16, #tpu.memory_space<vmem>>, %arg2: memref<16x128xbf16, #tpu.memory_space<vmem>>, %arg3: memref<16x128xbf16, #tpu.memory_space<vmem>>) attributes {dimension_semantics = [#tpu.dimension_semantics<parallel>], iteration_bounds = array<i64: 1>, scalar_prefetch = 0 : i64, scratch_operands = 0 : i64, tpu.core_type = #tpu.core_type<tc>, window_params = [{pipeline_mode = #tpu.pipeline_mode<synchronous>, transform_indices = @transform_0, window_bounds = array<i64: 16, 16>}, {transform_indices = @transform_1, window_bounds = array<i64: 16, 128>}, {transform_indices = @transform_2, window_bounds = array<i64: 16, 128>}]} {
    %c0 = arith.constant 0 : index
    %c0_0 = arith.constant 0 : index
    %0 = vector.load %arg1[%c0, %c0_0] : memref<16x16xbf16, #tpu.memory_space<vmem>>, vector<16x16xbf16>
    %c0_1 = arith.constant 0 : index
    %c0_2 = arith.constant 0 : index
    %1 = vector.load %arg2[%c0_1, %c0_2] : memref<16x128xbf16, #tpu.memory_space<vmem>>, vector<16x128xbf16>
    %cst = arith.constant dense<0.000000e+00> : vector<16x128xf32>
    %2 = tpu.matmul %0, %1, %cst {dimension_numbers = #tpu.dot_dimension_numbers<[1], [0], [0], [1], [0, 0, 1, 1], [], []>} : vector<16x16xbf16>, vector<16x128xbf16>, vector<16x128xf32> -> vector<16x128xf32>
    %3 = arith.truncf %2 : vector<16x128xf32> to vector<16x128xbf16>
    %c0_3 = arith.constant 0 : index
    %c0_4 = arith.constant 0 : index
    %4 = vector.load %arg3[%c0_3, %c0_4] : memref<16x128xbf16, #tpu.memory_space<vmem>>, vector<16x128xbf16>
    tpu.vector_store %arg3[%c0_3, %c0_4], %3 {strides = array<i32>} : memref<16x128xbf16, #tpu.memory_space<vmem>>, vector<16x128xbf16>,
    return
  }
  func.func @transform_0(%arg0: i32) -> (i32, i32) {
    %c0_i32 = arith.constant 0 : i32
    %c0_i32_0 = arith.constant 0 : i32
    %c0_i32_1 = arith.constant 0 : i32
    return %c0_i32, %c0_i32_0 : i32, i32
  }
  func.func @transform_1(%arg0: i32) -> (i32, i32) {
    %c0_i32 = arith.constant 0 : i32
    %c0_i32_0 = arith.constant 0 : i32
    return %c0_i32, %arg0 : i32, i32
  }
  func.func @transform_2(%arg0: i32) -> (i32, i32) {
    %c0_i32 = arith.constant 0 : i32
    %c0_i32_0 = arith.constant 0 : i32
    return %c0_i32, %arg0 : i32, i32
  }
}

</mosaic_0001>

<bundles_post_ra>
// kernel: elastic_deform.1
= control target key start
LH: loop header
LB: loop body
LE: loop exit
PB: predicated region body
PF: predicated region fallthrough
CT: control target
= control target key end

     0   :  { %v110_v0 = vmov 0.0   ;;  %vm111_vm0 = vmmov 0   ;;  %vm27_vm1 = vcmask 130048   ;;  %s136_s1 = inlined_call_operand.vmem [shape: bf16[16,128], index: 1, kind: input, shape index: {}]   ;;  %s137_s0 = inlined_call_operand.vmem [shape: bf16[16,16], index: 0, kind: input, shape index: {}]   ;;  %s138_s2 = inlined_call_operand.vmem [shape: bf16[16,128], index: 2, kind: output, shape index: {}]  }
   0x1   :  { %100 = vmatprep.subr.bf16.mxu0 %v110_v0  ;;  %v108_v1 = vld [vmem:[%s136_s1] sm:$0xff]   ;;  %102 = vmatprep.mubr.msk.bf16.mxu0 %vm111_vm0, %v110_v0 }
   0x2   :  { %v109_v2 = vld [vmem:[%s137_s0] sm:$0xff]   ;;  %101 = vmatpush3.bf16.msra.mxu0 %v108_v1 }
   0x5   :  { %103 = vmatmul.mubr.msk.bf16.vlgmr.msra.gmra.mxu0 %vm27_vm1, %v109_v2 }
  0xc5   :  { %v65_v3 = vpop.f32.mrf.mxu0 }
  0xc7   :  { %v104_v4 = vpop.f32.mrf.mxu0 }
  0xc9   :  { %v68_v5 = vpop.f32.mrf.mxu0 }
  0xca   :  { %v96_v6 = vpack.c.bf16 %v68_v5, %v65_v3 }
  0xcb   :  { %v105_v7 = vpop.f32.mrf.mxu0 }
  0xcc   :  { %97 = vst [vmem:[%s138_s2] sm:$0xff] %v96_v6  }

</bundles_post_ra>
